<compile_context>
chip_gen: v7x
topology: tpu7x:2x2x1
jax: 0.10.0
libtpu: 0.0.40
codegen_flags: <defaults>
</compile_context>

<pallas_src>
import functools

import jax
import jax.numpy as jnp
from jax.experimental import pallas as pl
from jax.experimental.pallas import tpu as pltpu


# --------------------------------------------------------------------------------------
# Kernel: pure data movement — write both sources into column slices of the output tile.
# --------------------------------------------------------------------------------------
def _concat_kernel(x_ref, s_ref, o_ref):
    d_in = x_ref.shape[-1]
    # out[:, :d_in]  = input_data tile                  (lane-dense vst when d_in % 128 == 0)
    # out[:, d_in:]  = dropout(sublayer_output) tile    (eval-mode dropout = identity;
    #                                                     dtype cast done here, not in wrapper)
    o_ref[:, :d_in] = x_ref[...]
    o_ref[:, d_in:] = s_ref[...].astype(o_ref.dtype)


# --------------------------------------------------------------------------------------
# Hardware / tiling helpers (plain Python, evaluated once per shape).
# --------------------------------------------------------------------------------------
def _chip_vmem_bytes():
    try:
        v = int(pltpu.get_tpu_info().vmem_capacity_bytes)
        if v > 0:
            return v
    except Exception:
        pass
    return 64 * 1024 * 1024  # conservative default: v7x per-TensorCore VMEM


def _sublane_multiple(dtype):
    # Sublane packing: 8 rows for 32-bit, 16 for 16-bit, 32 for 8-bit dtypes.
    return {4: 8, 2: 16, 1: 32}.get(jnp.dtype(dtype).itemsize, 8)


def _pick_block_rows(rows, d_in, d_sub, x_dtype, s_dtype, tile_budget_bytes):
    x_is = jnp.dtype(x_dtype).itemsize
    s_is = jnp.dtype(s_dtype).itemsize
    d_out = d_in + d_sub
    per_row = d_in * x_is + d_sub * s_is + d_out * x_is
    mult = max(_sublane_multiple(x_dtype), _sublane_multiple(s_dtype))

    # Biggest tile that fits double-buffered (in + out) in the budget, capped at 4096 rows.
    cand = min(4096, tile_budget_bytes // max(2 * per_row, 1))

    # Prefer >=2 grid tiles so the "parallel" axis can shard across v7x's two TensorCores.
    if rows > mult:
        half = -(-rows // 2)                 # ceil(rows / 2)
        half = -(-half // mult) * mult       # round up to the sublane multiple
        cand = min(cand, half)

    # Sublane-align, never below one sublane group.
    cand = max(mult, (cand // mult) * mult)
    if cand >= rows:
        return rows                          # single full-extent block (always legal)
    return int(cand)


# --------------------------------------------------------------------------------------
# pallas_call wrapper over 2-D (rows, features) views.
# --------------------------------------------------------------------------------------
@functools.partial(jax.jit, static_argnames=("block_rows", "vmem_limit"))
def _concat_last_dim(x2d, s2d, *, block_rows, vmem_limit):
    rows, d_in = x2d.shape
    d_sub = s2d.shape[1]
    d_out = d_in + d_sub

    x_is = jnp.dtype(x2d.dtype).itemsize
    s_is = jnp.dtype(s2d.dtype).itemsize

    cost = pl.CostEstimate(
        flops=0,
        transcendentals=0,
        bytes_accessed=int(rows * (d_in * x_is + d_sub * s_is + d_out * x_is)),
    )

    grid = (pl.cdiv(rows, block_rows),)

    return pl.pallas_call(
        _concat_kernel,
        out_shape=jax.ShapeDtypeStruct((rows, d_out), x2d.dtype),
        grid_spec=pltpu.PrefetchScalarGridSpec(
            num_scalar_prefetch=0,
            grid=grid,
            in_specs=[
                pl.BlockSpec((block_rows, d_in), lambda i: (i, 0)),   # input_data tile
                pl.BlockSpec((block_rows, d_sub), lambda i: (i, 0)),  # sublayer_output tile
            ],
            out_specs=pl.BlockSpec((block_rows, d_out), lambda i: (i, 0)),
        ),
        compiler_params=pltpu.CompilerParams(
            dimension_semantics=("parallel",),   # independent row tiles -> megacore sharding
            vmem_limit_bytes=int(vmem_limit),
        ),
        cost_estimate=cost,
    )(x2d, s2d)


# --------------------------------------------------------------------------------------
# Public entry point mirroring Concate_Block.forward (eval mode).
# --------------------------------------------------------------------------------------
def concate_block(input_data, sublayer_output, *, block_rows=None):
    """Concate_Block.forward (eval mode).

    input_data:       [B, S, d_in]
    sublayer_output:  [B, S, d_sub] or a tuple/list whose first element is that tensor
                      (mirrors `if isinstance(sublayer_output, tuple): sublayer_output[0]`).
    Returns:          [B, S, d_in + d_sub] = concat(input_data, dropout(sublayer_output), dim=2)
    """
    if isinstance(sublayer_output, (tuple, list)):
        sublayer_output = sublayer_output[0]

    assert input_data.ndim == 3 and sublayer_output.ndim == 3
    B, S, d_in = input_data.shape
    Bs, Ss, d_sub = sublayer_output.shape
    assert (B, S) == (Bs, Ss), "leading dims of input and sublayer output must match"

    rows = B * S
    x_is = jnp.dtype(input_data.dtype).itemsize
    s_is = jnp.dtype(sublayer_output.dtype).itemsize
    d_out = d_in + d_sub
    per_row = d_in * x_is + d_sub * s_is + d_out * x_is

    # Per-generation-safe VMEM ceiling: ~48 MiB on v7x (64 MiB physical), ~96 MiB on v5e/v6e.
    chip_vmem = _chip_vmem_bytes()
    vmem_cap = min(chip_vmem * 3 // 4, 96 * 1024 * 1024)
    tile_budget = max(8 * 1024 * 1024, vmem_cap - 4 * 1024 * 1024)  # headroom for scratch

    if block_rows is None:
        block_rows = _pick_block_rows(
            rows, d_in, d_sub, input_data.dtype, sublayer_output.dtype, tile_budget
        )
    else:
        mult = max(_sublane_multiple(input_data.dtype),
                   _sublane_multiple(sublayer_output.dtype))
        block_rows = int(block_rows)
        if block_rows < rows:
            block_rows = max(mult, (block_rows // mult) * mult)
        else:
            block_rows = rows

    # Explicit scoped-VMEM limit (double-buffered tiles + headroom), clamped to the chip cap.
    bytes_per_step = block_rows * per_row
    vmem_limit = min(vmem_cap, max(16 * 1024 * 1024, 2 * bytes_per_step + (2 << 20)))

    out2d = _concat_last_dim(
        input_data.reshape(rows, d_in),
        sublayer_output.reshape(rows, d_sub),
        block_rows=int(block_rows),
        vmem_limit=int(vmem_limit),
    )
    return out2d.reshape(B, S, d_out)


# --------------------------------------------------------------------------------------
# Self-test.
# --------------------------------------------------------------------------------------
if __name__ == "__main__":
    key = jax.random.PRNGKey(0)
    kx, kw, kx2, kw2 = jax.random.split(key, 4)

    # ---- Test 1: lane-dense configuration (d_in, d_sub multiples of 128) -------------
    batch, seq, hidden, sub_hidden = 2, 8, 128, 128
    x = jax.random.normal(kx, (batch, seq, hidden), jnp.float32)

    # Stand-in "sublayer": a linear projection returning a tuple (mirrors an RNN-style
    # sublayer returning (output, state)); applied outside the kernel.
    w = jax.random.normal(kw, (hidden, sub_hidden), jnp.float32) * 0.1
    sublayer = lambda t: (t @ w, None)
    sub_out = sublayer(x)

    y = jax.block_until_ready(concate_block(x, sub_out))
    y_ref = jnp.concatenate([x, sub_out[0]], axis=2)
    assert y.shape == (batch, seq, hidden + sub_hidden)
    assert y.dtype == x.dtype
    assert jnp.array_equal(y, y_ref)

    # ---- Test 2: non-128-aligned widths + mixed dtype (in-kernel cast, masked stores) -
    h2, s2 = 32, 48
    x2 = jax.random.normal(kx2, (batch, seq, h2), jnp.bfloat16)
    w2 = jax.random.normal(kw2, (h2, s2), jnp.float32) * 0.1
    sub2 = (x2.astype(jnp.float32) @ w2,)          # tuple, f32 output -> cast happens in-kernel

    y2 = jax.block_until_ready(concate_block(x2, sub2))
    y2_ref = jnp.concatenate([x2, sub2[0].astype(x2.dtype)], axis=2)
    assert y2.shape == (batch, seq, h2 + s2)
    assert y2.dtype == x2.dtype
    assert jnp.allclose(y2.astype(jnp.float32), y2_ref.astype(jnp.float32),
                        rtol=1e-2, atol=1e-2)

    print("KERNEL_OK")
</pallas_src>

<mosaic_0001>
module attributes {stable_mosaic.version = 11 : i64} {
  func.func @_concat_kernel(%arg0: i32, %arg1: memref<8x128xf32, #tpu.memory_space<vmem>>, %arg2: memref<8x128xf32, #tpu.memory_space<vmem>>, %arg3: memref<8x256xf32, #tpu.memory_space<vmem>>) attributes {dimension_semantics = [#tpu.dimension_semantics<parallel>], iteration_bounds = array<i64: 2>, scalar_prefetch = 0 : i64, scratch_operands = 0 : i64, tpu.core_type = #tpu.core_type<tc>, window_params = [{transform_indices = @transform_0, window_bounds = array<i64: 8, 128>}, {transform_indices = @transform_1, window_bounds = array<i64: 8, 128>}, {transform_indices = @transform_2, window_bounds = array<i64: 8, 256>}]} {
    %c0 = arith.constant 0 : index
    %c0_0 = arith.constant 0 : index
    %0 = vector.load %arg1[%c0, %c0_0] : memref<8x128xf32, #tpu.memory_space<vmem>>, vector<8x128xf32>
    %c0_1 = arith.constant 0 : index
    %c0_2 = arith.constant 0 : index
    %1 = vector.load %arg3[%c0_1, %c0_2] : memref<8x256xf32, #tpu.memory_space<vmem>>, vector<8x128xf32>
    tpu.vector_store %arg3[%c0_1, %c0_2], %0 {strides = array<i32>} : memref<8x256xf32, #tpu.memory_space<vmem>>, vector<8x128xf32>,
    %c0_3 = arith.constant 0 : index
    %c0_4 = arith.constant 0 : index
    %2 = vector.load %arg2[%c0_3, %c0_4] : memref<8x128xf32, #tpu.memory_space<vmem>>, vector<8x128xf32>
    %c0_5 = arith.constant 0 : index
    %c128 = arith.constant 128 : index
    %3 = vector.load %arg3[%c0_5, %c128] : memref<8x256xf32, #tpu.memory_space<vmem>>, vector<8x128xf32>
    tpu.vector_store %arg3[%c0_5, %c128], %2 {strides = array<i32>} : memref<8x256xf32, #tpu.memory_space<vmem>>, vector<8x128xf32>,
    return
  }
  func.func @transform_0(%arg0: i32) -> (i32, i32) {
    %c0_i32 = arith.constant 0 : i32
    %c0_i32_0 = arith.constant 0 : i32
    return %arg0, %c0_i32 : i32, i32
  }
  func.func @transform_1(%arg0: i32) -> (i32, i32) {
    %c0_i32 = arith.constant 0 : i32
    %c0_i32_0 = arith.constant 0 : i32
    return %arg0, %c0_i32 : i32, i32
  }
  func.func @transform_2(%arg0: i32) -> (i32, i32) {
    %c0_i32 = arith.constant 0 : i32
    %c0_i32_0 = arith.constant 0 : i32
    return %arg0, %c0_i32 : i32, i32
  }
}

</mosaic_0001>

<bundles_post_ra>
// kernel: _concat_last_dim.1
= control target key start
LH: loop header
LB: loop body
LE: loop exit
PB: predicated region body
PF: predicated region fallthrough
CT: control target
= control target key end

     0   :  { %7 = vsyncpa [#allocation3], 0  ;;  %s736_s0 = inlined_call_operand.hbm [shape: f32[16,128], index: 0, kind: input, shape index: {}]   ;;  %s737_s1 = inlined_call_operand.hbm [shape: f32[16,128], index: 1, kind: input, shape index: {}]   ;;  %s738_s2 = inlined_call_operand.hbm [shape: f32[16,256], index: 2, kind: output, shape index: {}]  }
   0x1   :  { %9 = vsyncpa [#allocation3 + $0x1], 0 }
   0x2   :  { %10 = vsyncpa [#allocation6], 0 }
   0x3   :  { %12 = vsyncpa [#allocation6 + $0x1], 0 }
   0x4   :  { %13 = vsyncpa [#allocation4], 0 }
   0x5   :  { %15 = vsyncpa [#allocation4 + $0x1], 0  ;;  %s526_s9 = smov 0   ;;  %s528_s10 = smov 0  }
   0x6   :  { %s530_s11 = smov 0   ;;  %s532_s12 = smov 0  }
   0x7 LB: > { %s547_s13 = sadd.s32 4294967295, %s506_s12   ;;  %s308_s14 = sadd.s32 4294967294, %s506_s12   ;;  %s506_s12 = sphi %s532_s12, %s757_s12   ;;  %s502_s11 = sphi %s530_s11, %s756_s11   ;;  %s498_s10 = sphi %s528_s10, %s755_s10   ;;  %s494_s9 = sphi %s526_s9, %s754_s9  }
   0x8   : > { %s551_s15 = sadd.s32 1, %s506_s12   ;;  %s28_s16 = sadd.s32 1, %s502_s11 }
   0x9   : > { %s25_s17 = ssub.s32 %s506_s12, %s551_s15  ;;  %p35_p0 = scmp.ne.s32.totalorder %s502_s11, %s498_s10 }
   0xa   : > { %p26_p1 = scmp.eq.s32.totalorder %s25_s17, 0  ;;  %p36_p2 = scmp.eq.s32.totalorder %s506_s12, 0 }
   0xb   : > { %p41_p3 = scmp.ne.s32.totalorder %s498_s10, %s494_s9  ;;  %p42_p4 = scmp.eq.s32.totalorder %s547_s13, 0 }
   0xc   : > { %s563_s18 = scalar_select %p26_p1, %s502_s11, %s28_s16  }
   0xd   : > { %p565_p5 = por %p36_p2, %p35_p0  ;;  %p569_p6 = por %p42_p4, %p41_p3 }
   0xe   : > { %p91_p7 = scmp.eq.s32.totalorder %s547_s13, 1  ;;  %p97_p8 = scmp.eq.s32.totalorder %s308_s14, 1 }
   0xf   : > { %s742_s20 = scalar_select %p569_p6, 1, 0 }
  0x10   : > { %p342_p10 = scmp.lt.s32.totalorder %s506_s12, 2  ;;  %p576_p11 = por %p91_p7, %p35_p0 }
  0x11   : > { %p580_p12 = por %p97_p8, %p41_p3  ;;  %s585_s23 = sand.u32 1, %s502_s11  }
  0x12   : > { %s743_s21 = scalar_select %p576_p11, 1, 0 }
  0x13   : > { %s744_s22 = scalar_select %p580_p12, 1, 0 }
  0x14   : > { %s312_s24 = sshll.u32 %s506_s12, 7  ;;  %s311_s25 = sshll.u32 %s585_s23, 3 }
  0x15   : > { %s594_s28 = scalar_lea.hbm %s736_s0, %s312_s24  ;;  %s121_s29 = scalar_lea.vmem [#allocation2], %s311_s25 }
  0x16   : > { %s128_s30 = sshll.u32 %s121_s29, 4  ;;  %p600_p13 = pnand %p342_p10, %p565_p5  ;;  %s604_s30 = int_to_ptr.vmem [resolvable:$true] %s128_s30 }
  0x17   : > { %s118_s4 = scalar_lea.sflag [#allocation3], %s585_s23  ;;  %s376_s5 = scalar_lea.hbm %s594_s28, 128 }
  0x18   : > { %p377_p2 = scmp.ne.s32.totalorder %s594_s28, %s376_s5  ;;  %p378_p3 = pneg %p600_p13 }
  0x19   : > { %s381_s8 = scalar_lea.hbm %s736_s0, 256  ;;  %p382_p5 = scmp.lt.u32.totalorder %s594_s28, %s736_s0 }
  0x1a   : > { %p379_p4 = pnand %p378_p3, %p377_p2  ;;  %p383_p8 = scmp.lt.u32.totalorder %s381_s8, %s376_s5 }
  0x1b   : > { %p385_p9 = scmp.lt.u32.totalorder %s376_s5, %s594_s28 }
  0x1c   : > { %p380_p7 = pneg %p379_p4  ;;  %p384_p10 = por %p383_p8, %p382_p5 }
  0x1e   : > { %p386_p0 = por %p385_p9, %p384_p10 }
  0x20   : > { %p387_p1 = pnand %p386_p0, %p380_p7 }
  0x22   : > { %390 = shalt.err (!%p387_p1)
}
  0x23   : > { %s391_s17 = scalar_lea.vmem %s604_s30, 128  ;;  %s508_s19 = smov [#allocation2]  }
  0x24   : > { %p392_p2 = scmp.ne.s32.totalorder %s604_s30, %s391_s17  ;;  %s396_s26 = sshll.u32 %s508_s19, 4  ;;  %s397_s26 = int_to_ptr.vmem [resolvable:$false] %s396_s26 }
  0x25   : > { %s398_s27 = scalar_lea.vmem %s397_s26, 256  ;;  %p399_p11 = scmp.lt.s32.totalorder %s604_s30, %s397_s26 }
  0x26   : > { %p394_p4 = pnand %p392_p2, %p378_p3  ;;  %p400_p5 = scmp.lt.s32.totalorder %s398_s27, %s391_s17 }
  0x28   : > { %p395_p12 = pneg %p394_p4  ;;  %p401_p8 = por %p400_p5, %p399_p11 }
  0x2a   : > { %p402_p9 = pnand %p401_p8, %p395_p12 }
  0x2c   : > { %405 = shalt.err (!%p402_p9)
}
  0x2d   : > { %334 = dma.hbm_to_vmem [thread:$0]  (!%p600_p13), %s594_s28, 128, %s604_s30, %s118_s4  }
  0x2e   : > { %p746_p0 = scmp.lt.s32.totalorder %s506_s12, 3  ;;  %p747_p1 = scmp.ge.s32.totalorder %s506_s12, 1 }
  0x2f   : > { %s647_s7 = scalar_lea.hbm %s737_s1, %s312_s24  ;;  %s139_s8 = scalar_lea.vmem [#allocation5], %s311_s25 }
  0x30   : > { %p638_p7 = pnand %p747_p1, %p746_p0  ;;  %s146_s14 = sshll.u32 %s139_s8, 4  ;;  %s147_s14 = int_to_ptr.vmem [resolvable:$true] %s146_s14 }
  0x31   : > { %s136_s28 = scalar_lea.sflag [#allocation6], %s585_s23  ;;  %s406_s30 = scalar_lea.hbm %s647_s7, 128 }
  0x32   : > { %s748_s29 = scalar_select %p638_p7, 1, 0 }
  0x33   : > { %p407_p11 = scmp.ne.s32.totalorder %s647_s7, %s406_s30  ;;  %s411_s24 = scalar_lea.hbm %s737_s1, 256 }
  0x34   : > { %p412_p2 = scmp.lt.u32.totalorder %s647_s7, %s737_s1  ;;  %p413_p4 = scmp.lt.u32.totalorder %s411_s24, %s406_s30 }
  0x35   : > { %p409_p12 = pnand %p407_p11, %p378_p3  ;;  %p415_p8 = scmp.lt.u32.totalorder %s406_s30, %s647_s7 }
  0x36   : > { %p414_p5 = por %p413_p4, %p412_p2 }
  0x37   : > { %p410_p10 = pneg %p409_p12 }
  0x38   : > { %p416_p9 = por %p415_p8, %p414_p5 }
  0x3a   : > { %p417_p0 = pnand %p416_p9, %p410_p10 }
  0x3c   : > { %420 = shalt.err (!%p417_p0)
}
  0x3d   : > { %s421_s23 = scalar_lea.vmem %s147_s14, 128  ;;  %s509_s25 = smov [#allocation5]  }
  0x3e   : > { %p422_p1 = scmp.ne.s32.totalorder %s147_s14, %s421_s23  ;;  %s426_s26 = sshll.u32 %s509_s25, 4  ;;  %s427_s26 = int_to_ptr.vmem [resolvable:$false] %s426_s26 }
  0x3f   : > { %s428_s27 = scalar_lea.vmem %s427_s26, 256  ;;  %p429_p6 = scmp.lt.s32.totalorder %s147_s14, %s427_s26 }
  0x40   : > { %p424_p11 = pnand %p422_p1, %p378_p3  ;;  %p430_p7 = scmp.lt.s32.totalorder %s428_s27, %s421_s23 }
  0x42   : > { %p425_p12 = pneg %p424_p11  ;;  %p431_p2 = por %p430_p7, %p429_p6 }
  0x44   : > { %p432_p4 = pnand %p431_p2, %p425_p12 }
  0x46   : > { %435 = shalt.err (!%p432_p4)
}
  0x47   : > { %337 = dma.hbm_to_vmem [thread:$0]  (!%p600_p13), %s647_s7, 128, %s147_s14, %s136_s28  }
  0x48   : > { %p749_p10 = scmp.ne.s32.totalorder %s748_s29, 0 }
  0x49   : > { %s674_s5 = sand.u32 (!%p749_p10), 1, %s498_s10   ;;  %p750_p3 = scmp.ne.s32.totalorder (!%p749_p10), %s742_s20, 0 }
  0x4a   : > { %155 = sbr.rel (%p749_p10) target bundleno = 110 (0x6e), region = 28  ;;  %s316_s6 = sshll.u32 (!%p749_p10), %s674_s5, 3 }
  0x4b   : > { %s158_s8 = scalar_lea.sflag (!%p749_p10), [#allocation3], %s674_s5  ;;  %s161_s30 = scalar_lea.vmem (!%p749_p10), [#allocation2], %s316_s6 }
  0x51   : > { %481 = dma.done.wait (%p750_p3), %s158_s8, 128  }
  0x52   : > { %483 = vsyncadd (%p750_p3), %s158_s8, 4294967168  ;;  %s167_s3 = scalar_lea.sflag [#allocation6], %s674_s5  ;;  %s170_s7 = scalar_lea.vmem [#allocation5], %s316_s6 }
  0x53   : > { %485 = dma.done.wait (%p750_p3), %s167_s3, 128  }
  0x54   : > { %487 = vsyncadd (%p750_p3), %s167_s3, 4294967168  ;;  %s318_s29 = sshll.u32 %s674_s5, 4  ;;  %s324_s4 = sshll.u32 %s547_s13, 8  ;;  %v196_v0 = vld [vmem:[%s161_s30] sm:$0xff]  ;;  %v198_v1 = vld [vmem:[%s170_s7] sm:$0xff] }
  0x55   : > { %s195_s14 = scalar_lea.vmem [#allocation7], %s318_s29  ;;  %s694_s17 = scalar_lea.hbm %s738_s2, %s324_s4 }
  0x56   : > { %s215_s28 = sshll.u32 %s195_s14, 4  ;;  %197 = vst [vmem:[%s195_s14] sm:$0xff] %v196_v0  ;;  %199 = vst [vmem:[%s195_s14 + $0x8] sm:$0xff] %v198_v1  ;;  %s201_s20 = scalar_lea.sflag [#allocation4], %s674_s5  ;;  %s689_s28 = int_to_ptr.vmem [resolvable:$true] %s215_s28 }
  0x57   : > { %s436_s19 = scalar_lea.vmem %s689_s28, 256  ;;  %p751_p13 = scmp.ne.s32.totalorder %s743_s21, 0 }
  0x58   : > { %p437_p6 = scmp.ne.s32.totalorder %s689_s28, %s436_s19  ;;  %s510_s13 = smov [#allocation7]  }
  0x59   : > { %s440_s23 = sshll.u32 %s510_s13, 4  ;;  %s441_s23 = int_to_ptr.vmem [resolvable:$false] %s440_s23 }
  0x5a   : > { %p438_p7 = pnand %p437_p6, %p751_p13  ;;  %s442_s25 = scalar_lea.vmem %s441_s23, 512 }
  0x5b   : > { %p443_p8 = scmp.lt.s32.totalorder %s689_s28, %s441_s23  ;;  %p444_p9 = scmp.lt.s32.totalorder %s442_s25, %s436_s19 }
  0x5c   : > { %p439_p5 = pneg %p438_p7 }
  0x5d   : > { %p445_p0 = por %p444_p9, %p443_p8 }
  0x5f   : > { %p446_p1 = pnand %p445_p0, %p439_p5 }
  0x61   : > { %449 = shalt.err (!%p446_p1)
}
  0x62   : > { %s450_s26 = scalar_lea.hbm %s694_s17, 256  ;;  %s454_s6 = scalar_lea.hbm %s738_s2, 512 }
  0x63   : > { %p451_p11 = scmp.ne.s32.totalorder %s694_s17, %s450_s26  ;;  %p455_p4 = scmp.lt.u32.totalorder %s694_s17, %s738_s2 }
  0x64   : > { %p456_p10 = scmp.lt.u32.totalorder %s454_s6, %s450_s26  ;;  %p458_p6 = scmp.lt.u32.totalorder %s450_s26, %s694_s17 }
  0x65   : > { %p452_p12 = pnand %p451_p11, %p751_p13 }
  0x66   : > { %p457_p3 = por %p456_p10, %p455_p4 }
  0x67   : > { %p453_p2 = pneg %p452_p12 }
  0x68   : > { %p459_p7 = por %p458_p6, %p457_p3 }
  0x6a   : > { %p460_p5 = pnand %p459_p7, %p453_p2 }
  0x6c   : > { %463 = shalt.err (!%p460_p5)
}
  0x6d   : > { %329 = dma.vmem_to_hbm [thread:$0]  (%p751_p13), %s689_s28, 256, %s694_s17, %s201_s20  }
  0x6e PF: > { %s227_s3 = sand.u32 1, %s494_s9   ;;  %p752_p8 = scmp.ne.s32.totalorder %s744_s22, 0 }
  0x6f   : > { %p753_p9 = scmp.ge.s32.totalorder %s506_s12, 2  ;;  %s228_s7 = scalar_lea.sflag [#allocation4], %s227_s3 }
  0x71   : > { %p339_p0 = pnand %p753_p9, %p752_p8 }
  0x73   : > { %489 = dma.done.wait (!%p339_p0), %s228_s7, 256  }
  0x74   : > { %491 = vsyncadd (!%p339_p0), %s228_s7, 4294967040  ;;  %p18_p1 = scmp.ge.s32.totalorder %s551_s15, 4   ;;  %s754_s9 = smov %s498_s10 }
  0x75   : > { %s755_s10 = smov %s502_s11  ;;  %s756_s11 = smov %s563_s18 }
  0x76   : > { %s757_s12 = smov %s551_s15  ;;  %20 = sbr.rel (!%p18_p1) target bundleno = 7 (0x7), region = 86 }
  0x7d   :  { %233 = vsyncpa [#allocation3], 1 }
  0x7e   :  { %235 = vsyncpa [#allocation3 + $0x1], 1 }
  0x7f   :  { %236 = vsyncpa [#allocation6], 1 }
  0x80   :  { %238 = vsyncpa [#allocation6 + $0x1], 1 }
  0x81   :  { %239 = vsyncpa [#allocation4], 1 }
  0x82   :  { %241 = vsyncpa [#allocation4 + $0x1], 1 }

</bundles_post_ra>
